<compile_context>
chip_gen: v6e
topology: v6e:2x2x1
jax: 0.10.0
libtpu: 0.0.40
codegen_flags: <defaults>
</compile_context>

<pallas_src>
import numpy as np
import jax
import jax.numpy as jnp
from jax import lax
from jax.experimental import pallas as pl
from jax.experimental.pallas import tpu as pltpu


def _gather_kernel(idx_ref, p_ref, o_ref):
    # idx_ref: SMEM (b,) int32      (scalar-prefetch; read per-row inside kernel)
    # p_ref:   VMEM (num_cams, F)   whole flattened param table, resident
    # o_ref:   VMEM (b, F)          whole flattened output slab
    b = o_ref.shape[0]

    def body(g, carry):
        row = idx_ref[g]                                   # scalar read from SMEM
        o_ref[pl.ds(g, 1), :] = p_ref[pl.ds(row, 1), :]    # in-VMEM dynamic row copy
        return carry

    lax.fori_loop(0, b, body, 0, unroll=True)


def learn_focal_forward(param, i):
    """Pallas equivalent of LearnFocal.forward: returns param[i]."""
    i = jnp.asarray(i, dtype=jnp.int32)
    scalar_input = (i.ndim == 0)
    if scalar_input:
        i = i.reshape((1,))

    num_cams = param.shape[0]
    tail_shape = param.shape[1:]
    flat = int(np.prod(tail_shape)) if tail_shape else 1
    b = i.shape[0]

    # Degenerate empty batch: don't launch a zero-size kernel.
    if b == 0:
        return jnp.zeros((0,) + tail_shape, dtype=param.dtype)

    # torch-style negative indexing support (param[-1] == param[num_cams-1]).
    i = jnp.where(i < 0, i + num_cams, i)

    param2d = param.reshape(num_cams, flat)

    out2d = pl.pallas_call(
        _gather_kernel,
        out_shape=jax.ShapeDtypeStruct((b, flat), param.dtype),
        grid_spec=pltpu.PrefetchScalarGridSpec(
            num_scalar_prefetch=1,
            grid=(1,),  # single step: one param DMA in, one output DMA out
            in_specs=[
                # Whole param table as one resident VMEM block.
                pl.BlockSpec((num_cams, flat), lambda g, idx_ref: (0, 0)),
            ],
            # Whole output as one lane-dense slab.
            out_specs=pl.BlockSpec((b, flat), lambda g, idx_ref: (0, 0)),
        ),
        compiler_params=pltpu.CompilerParams(
            dimension_semantics=("arbitrary",),
        ),
    )(i, param2d)

    out = out2d.reshape((b,) + tail_shape)
    if scalar_input:
        out = out[0]
    return out


def make_intrinsic_init(num_cams):
    """Deterministic synthetic intrinsic_init: (num_cams, 3, 3) K matrices."""
    ks = []
    for n in range(num_cams):
        fx = 500.0 + 10.0 * n
        fy = 500.0 + 5.0 * n
        cx = 320.0 + n
        cy = 240.0 + 2.0 * n
        ks.append([[fx, 0.0, cx],
                   [0.0, fy, cy],
                   [0.0, 0.0, 1.0]])
    return np.asarray(ks, dtype=np.float32)


if __name__ == "__main__":
    num_cams = 8

    # Deterministic parameter init (mirrors nn.Parameter(torch.from_numpy(...))).
    param = jnp.asarray(make_intrinsic_init(num_cams))

    # Deterministic example input: a batch of camera indices.
    key = jax.random.PRNGKey(0)
    idx = jax.random.randint(key, (4,), 0, num_cams, dtype=jnp.int32)

    out = learn_focal_forward(param, idx)
    out = jax.block_until_ready(out)

    # Correctness check against plain-JAX gather (== torch param[i]).
    ref = param[idx]
    assert out.shape == (4, 3, 3)
    assert out.dtype == param.dtype
    np.testing.assert_allclose(np.asarray(out), np.asarray(ref), rtol=0, atol=0)

    # Scalar index path (torch: param[int] -> (3, 3)).
    out_scalar = jax.block_until_ready(learn_focal_forward(param, 3))
    np.testing.assert_allclose(np.asarray(out_scalar), np.asarray(param[3]))

    # Negative index path (torch: param[-1] -> last camera).
    out_neg = jax.block_until_ready(learn_focal_forward(param, -1))
    np.testing.assert_allclose(np.asarray(out_neg), np.asarray(param[num_cams - 1]))

    # Empty batch path.
    out_empty = learn_focal_forward(param, jnp.zeros((0,), jnp.int32))
    assert out_empty.shape == (0, 3, 3)

    print("KERNEL_OK")
</pallas_src>

<mosaic_0001>
module attributes {stable_mosaic.version = 11 : i64} {
  func.func @_gather_kernel(%arg0: i32, %arg1: memref<4xi32, #tpu.memory_space<smem>>, %arg2: memref<8x9xf32, #tpu.memory_space<vmem>>, %arg3: memref<4x9xf32, #tpu.memory_space<vmem>>) attributes {dimension_semantics = [#tpu.dimension_semantics<arbitrary>], iteration_bounds = array<i64: 1>, scalar_prefetch = 1 : i64, scratch_operands = 0 : i64, tpu.core_type = #tpu.core_type<tc>, window_params = [{pipeline_mode = #tpu.pipeline_mode<synchronous>, transform_indices = @transform_0, window_bounds = array<i64: 8, 9>}, {pipeline_mode = #tpu.pipeline_mode<synchronous>, transform_indices = @transform_1, window_bounds = array<i64: 4, 9>}]} {
    %c0_i32 = arith.constant 0 : i32
    %0 = arith.index_cast %c0_i32 : i32 to index
    %1 = memref.load %arg1[%0] : memref<4xi32, #tpu.memory_space<smem>>
    %2 = arith.index_cast %1 : i32 to index
    %c0 = arith.constant 0 : index
    %3 = vector.load %arg2[%2, %c0] : memref<8x9xf32, #tpu.memory_space<vmem>>, vector<1x9xf32>
    %4 = arith.index_cast %c0_i32 : i32 to index
    %c0_0 = arith.constant 0 : index
    %5 = vector.load %arg3[%4, %c0_0] : memref<4x9xf32, #tpu.memory_space<vmem>>, vector<1x9xf32>
    tpu.vector_store %arg3[%4, %c0_0], %3 {strides = array<i32>} : memref<4x9xf32, #tpu.memory_space<vmem>>, vector<1x9xf32>,
    %c1_i32 = arith.constant 1 : i32
    %6 = arith.index_cast %c1_i32 : i32 to index
    %7 = memref.load %arg1[%6] : memref<4xi32, #tpu.memory_space<smem>>
    %8 = arith.index_cast %7 : i32 to index
    %c0_1 = arith.constant 0 : index
    %9 = vector.load %arg2[%8, %c0_1] : memref<8x9xf32, #tpu.memory_space<vmem>>, vector<1x9xf32>
    %10 = arith.index_cast %c1_i32 : i32 to index
    %c0_2 = arith.constant 0 : index
    %11 = vector.load %arg3[%10, %c0_2] : memref<4x9xf32, #tpu.memory_space<vmem>>, vector<1x9xf32>
    tpu.vector_store %arg3[%10, %c0_2], %9 {strides = array<i32>} : memref<4x9xf32, #tpu.memory_space<vmem>>, vector<1x9xf32>,
    %c2_i32 = arith.constant 2 : i32
    %12 = arith.index_cast %c2_i32 : i32 to index
    %13 = memref.load %arg1[%12] : memref<4xi32, #tpu.memory_space<smem>>
    %14 = arith.index_cast %13 : i32 to index
    %c0_3 = arith.constant 0 : index
    %15 = vector.load %arg2[%14, %c0_3] : memref<8x9xf32, #tpu.memory_space<vmem>>, vector<1x9xf32>
    %16 = arith.index_cast %c2_i32 : i32 to index
    %c0_4 = arith.constant 0 : index
    %17 = vector.load %arg3[%16, %c0_4] : memref<4x9xf32, #tpu.memory_space<vmem>>, vector<1x9xf32>
    tpu.vector_store %arg3[%16, %c0_4], %15 {strides = array<i32>} : memref<4x9xf32, #tpu.memory_space<vmem>>, vector<1x9xf32>,
    %c3_i32 = arith.constant 3 : i32
    %18 = arith.index_cast %c3_i32 : i32 to index
    %19 = memref.load %arg1[%18] : memref<4xi32, #tpu.memory_space<smem>>
    %20 = arith.index_cast %19 : i32 to index
    %c0_5 = arith.constant 0 : index
    %21 = vector.load %arg2[%20, %c0_5] : memref<8x9xf32, #tpu.memory_space<vmem>>, vector<1x9xf32>
    %22 = arith.index_cast %c3_i32 : i32 to index
    %c0_6 = arith.constant 0 : index
    %23 = vector.load %arg3[%22, %c0_6] : memref<4x9xf32, #tpu.memory_space<vmem>>, vector<1x9xf32>
    tpu.vector_store %arg3[%22, %c0_6], %21 {strides = array<i32>} : memref<4x9xf32, #tpu.memory_space<vmem>>, vector<1x9xf32>,
    %c4_i32 = arith.constant 4 : i32
    return
  }
  func.func @transform_0(%arg0: i32, %arg1: memref<4xi32, #tpu.memory_space<smem>>) -> (i32, i32) {
    %c0_i32 = arith.constant 0 : i32
    %c0_i32_0 = arith.constant 0 : i32
    %c0_i32_1 = arith.constant 0 : i32
    return %c0_i32, %c0_i32_0 : i32, i32
  }
  func.func @transform_1(%arg0: i32, %arg1: memref<4xi32, #tpu.memory_space<smem>>) -> (i32, i32) {
    %c0_i32 = arith.constant 0 : i32
    %c0_i32_0 = arith.constant 0 : i32
    %c0_i32_1 = arith.constant 0 : i32
    return %c0_i32, %c0_i32_0 : i32, i32
  }
}

</mosaic_0001>

<bundles_post_ra>
// kernel: tpu_custom_call.1
= control target key start
LH: loop header
LB: loop body
LE: loop exit
PB: predicated region body
PF: predicated region fallthrough
CT: control target
= control target key end

     0   :  { %s122_s9 = smov [#allocation3]   ;;  %s149_s0 = inlined_call_operand.hbm [shape: s32[4], index: 0, kind: input, shape index: {}]   ;;  %s150_s1 = inlined_call_operand.hbm [shape: f32[8,9], index: 1, kind: input, shape index: {}]   ;;  %s151_s2 = inlined_call_operand.hbm [shape: f32[4,9], index: 2, kind: output, shape index: {}]  }
   0x1   :  { %8 = dma.hbm_to_smem %s149_s0, 16, %s122_s9, [#allocation2] }
   0x2   :  { %116 = dma.done.wait [#allocation2], 16 }
   0x3   :  { %117 = vsyncadd [#allocation2], 4294967280 }
   0x4   :  { %10 = sfence }
   0x5   :  { %11 = vsyncpa [#allocation5], 0 }
   0x6   :  { %12 = vsyncpa [#allocation6], 0  ;;  %s123_s12 = smov [#allocation4]  }
   0x7   :  { %s19_s13 = sshll.u32 %s123_s12, 4  ;;  %s20_s13 = int_to_ptr.vmem [resolvable:$true] %s19_s13 }
   0x8   :  { %s84_s14 = scalar_lea.vmem %s20_s13, 128  ;;  %p89_p1 = scmp.lt.s32.totalorder %s20_s13, %s20_s13 }
   0x9   :  { %p85_p0 = scmp.ne.s32.totalorder %s20_s13, %s84_s14  ;;  %p90_p2 = scmp.lt.s32.totalorder %s84_s14, %s84_s14 }
   0xb   :  { %p91_p3 = por %p90_p2, %p89_p1 }
   0xd   :  { %p92_p4 = pnand %p91_p3, %p85_p0 }
   0xf   :  { %95 = shalt.err (!%p92_p4)
}
  0x10   :  { %22 = dma.hbm_to_vmem [thread:$0]  %s150_s1, 128, %s20_s13, [#allocation5]  }
  0x11   :  { %118 = dma.done.wait [#allocation5], 128  }
  0x12   :  { %119 = vsyncadd [#allocation5], 4294967168  ;;  %s26_s0 = sld [smem:[#allocation3]]  ;;  %vm29_vm0 = vcmask 65536   ;;  %s124_s20 = smov [#allocation7]  }
  0x13   :  { %s62_s17 = sld [smem:[#allocation3 + $0x1]]  ;;  %s49_s21 = sshll.u32 %s124_s20, 4  ;;  %s50_s21 = int_to_ptr.vmem [resolvable:$true] %s49_s21 }
  0x14   :  { %s63_s18 = sld [smem:[#allocation3 + $0x2]]  ;;  %s96_s25 = scalar_lea.vmem %s50_s21, 64 }
  0x15   :  { %s64_s19 = sld [smem:[#allocation3 + $0x3]]  ;;  %p97_p5 = scmp.ne.s32.totalorder %s50_s21, %s96_s25 }
  0x16   :  { %p101_p6 = scmp.lt.s32.totalorder %s50_s21, %s50_s21  ;;  %p102_p7 = scmp.lt.s32.totalorder %s96_s25, %s96_s25 }
  0x18   :  { %s27_s22 = scalar_lea.vmem [#allocation4], %s26_s0  ;;  %p103_p8 = por %p102_p7, %p101_p6 }
  0x19   :  { %v28_v0 = vld [vmem:[%s27_s22] sm:$0x1]  ;;  %s32_s23 = scalar_lea.vmem [#allocation4], %s62_s17 }
  0x1a   :  { %30 = vst.msk [vmem:[#allocation7] sm:$0x1] %vm29_vm0, %v28_v0  ;;  %v33_v1 = vld [vmem:[%s32_s23] sm:$0x1]  ;;  %s36_s24 = scalar_lea.vmem [#allocation4], %s63_s18  ;;  %p104_p9 = pnand %p103_p8, %p97_p5 }
  0x1b   :  { %34 = vst.msk [vmem:[#allocation7 + $0x1] sm:$0x1] %vm29_vm0, %v33_v1  ;;  %v37_v2 = vld [vmem:[%s36_s24] sm:$0x1]  ;;  %s40_s1 = scalar_lea.vmem [#allocation4], %s64_s19 }
  0x1c   :  { %38 = vst.msk [vmem:[#allocation7 + $0x2] sm:$0x1] %vm29_vm0, %v37_v2  ;;  %v41_v3 = vld [vmem:[%s40_s1] sm:$0x1] }
  0x1d   :  { %42 = vst.msk [vmem:[#allocation7 + $0x3] sm:$0x1] %vm29_vm0, %v41_v3 }
  0x1e   :  { %107 = shalt.err (!%p104_p9)
}
  0x1f   :  { %52 = dma.vmem_to_hbm [thread:$0]  %s50_s21, 64, %s151_s2, [#allocation6]  }
  0x20   :  { %120 = dma.done.wait [#allocation6], 64  }
  0x21   :  { %121 = vsyncadd [#allocation6], 4294967232 }
  0x22   :  { %56 = vsyncpa [#allocation5], 1 }
  0x23   :  { %57 = vsyncpa [#allocation6], 1 }

</bundles_post_ra>
